<compile_context>
chip_gen: v6e
topology: v6e:2x2x1
jax: 0.10.0
libtpu: 0.0.40
codegen_flags: <defaults>
</compile_context>

<pallas_src>
import functools
import math

import numpy as np
import jax
import jax.numpy as jnp
from jax import lax
from jax.experimental import pallas as pl
from jax.experimental.pallas import tpu as pltpu


# --------------------------------------------------------------------------- #
# Static index helpers (PyTorch legacy 'nearest': src = floor(dst * in / out)) #
# --------------------------------------------------------------------------- #
def _nearest_src_indices(in_size: int, out_size: int) -> np.ndarray:
    dst = np.arange(out_size, dtype=np.int64)
    src = (dst * in_size) // out_size
    return np.clip(src, 0, in_size - 1)


def _col_one_hot(in_size: int, out_size: int) -> np.ndarray:
    """(W, W_out) one-hot: output column o selects input column src[o]."""
    src = _nearest_src_indices(in_size, out_size)
    oh = np.zeros((in_size, out_size), dtype=np.float32)
    oh[src, np.arange(out_size)] = 1.0
    return oh


def _build_h_plan(in_size: int, out_size: int, grp_h: int):
    """Static plan for the H replication, grouped into grp_h output rows.

    Each entry: (g0, gr, r_lo, nsrc, runs) where runs is a tuple of
    (local_src_row, local_out_start, length) covering the gr output rows.
    """
    src = _nearest_src_indices(in_size, out_size)
    plan = []
    for g0 in range(0, out_size, grp_h):
        gr = int(min(grp_h, out_size - g0))
        seg = [int(s) for s in src[g0:g0 + gr]]
        r_lo, r_hi = seg[0], seg[-1] + 1
        runs = []
        for j, s in enumerate(seg):
            if runs and runs[-1][0] == s - r_lo:
                runs[-1][2] += 1
            else:
                runs.append([s - r_lo, j, 1])
        runs = tuple((int(a), int(b), int(c)) for a, b, c in runs)
        plan.append((int(g0), gr, int(r_lo), int(r_hi - r_lo), runs))
    return tuple(plan)


def _padded_vmem_bytes(shape, dtype) -> int:
    """VMEM footprint of a (…, sublane, lane) array including tile padding."""
    it = jnp.dtype(dtype).itemsize
    sub = max(8, 32 // max(1, it))          # 8 f32 / 16 bf16 / 32 int8
    dims = [int(d) for d in shape]
    dims[-1] = -(-dims[-1] // 128) * 128
    if len(dims) >= 2:
        dims[-2] = -(-dims[-2] // sub) * sub
    n = 1
    for d in dims:
        n *= d
    return n * it


# --------------------------------------------------------------------------- #
# Kernel                                                                      #
# --------------------------------------------------------------------------- #
def _upsample_kernel(x_ref, sw_ref, o_ref, t_ref, *,
                     bnc, H, W_out, h_plan, compute_dtype, precision,
                     rows_per_dot):
    # x_ref : (bnc*H, W)           flattened input planes (rows of all planes)
    # sw_ref: (W, W_out)           one-hot column-selection matrix (fetched once)
    # o_ref : (bnc, H_out, W_out)  batched output planes
    # t_ref : (bnc*H, W_out)       scratch holding W-gathered rows (out dtype)

    # ---- Phase 1: W-direction gather -------------------------------------- #
    # One big matmul over all planes in the block (chunked in row slabs so the
    # live result stays bounded).  0/1 selection is exact (bf16 native path, or
    # f32 with HIGHEST precision).
    sw = sw_ref[...]
    M = bnc * H
    for r0 in range(0, M, rows_per_dot):
        rr = min(rows_per_dot, M - r0)
        lhs = x_ref[r0:r0 + rr, :]
        if lhs.dtype != jnp.dtype(compute_dtype):
            lhs = lhs.astype(compute_dtype)
        prod = jnp.dot(lhs, sw, precision=precision,
                       preferred_element_type=jnp.float32)
        t_ref[r0:r0 + rr, :] = prod.astype(t_ref.dtype)

    # ---- Phase 2: H-direction replication (pure data movement) ------------ #
    # Per plane (fori_loop bounds live ranges and code size); per sublane-tile
    # group of output rows: read the contiguous source-row range once, assemble
    # the replicated group in vregs (broadcast + iota select), single store.
    def plane_body(b, carry):
        t0 = b * H
        for (g0, gr, r_lo, nsrc, runs) in h_plan:
            start = t0 + r_lo
            if (H % 8 == 0) and (r_lo % 8 == 0):
                start = pl.multiple_of(start, 8)
            src = t_ref[pl.ds(start, nsrc), :]            # (nsrc, W_out)
            if len(runs) == 1:
                # Whole group comes from a single source row.
                grp = jnp.broadcast_to(src[0:1, :], (gr, W_out))
            elif len(runs) == gr and nsrc == gr:
                # Identity mapping within the group.
                grp = src
            else:
                row_ids = lax.broadcasted_iota(jnp.int32, (gr, 1), 0)
                grp = jnp.broadcast_to(src[runs[0][0]:runs[0][0] + 1, :],
                                       (gr, W_out))
                for (si, o0, _L) in runs[1:]:
                    grp = jnp.where(row_ids >= o0, src[si:si + 1, :], grp)
            o_ref[b, g0:g0 + gr, :] = grp.astype(o_ref.dtype)
        return carry

    lax.fori_loop(0, bnc, plane_body, 0)


# --------------------------------------------------------------------------- #
# Wrapper                                                                     #
# --------------------------------------------------------------------------- #
def upsample_nearest_2d(x: jax.Array, size=None, scale_factor=None) -> jax.Array:
    """Equivalent of F.interpolate(x, size, scale_factor, mode='nearest') for 4D NCHW."""
    if size is None and scale_factor is None:
        raise ValueError("Upsampling size and scale_factor cannot be both None.")
    N, C, H, W = x.shape

    if size is not None:
        if isinstance(size, (tuple, list)):
            H_out, W_out = int(size[0]), int(size[1])
        else:
            H_out = W_out = int(size)
    else:
        if isinstance(scale_factor, (tuple, list)):
            sh_f, sw_f = float(scale_factor[0]), float(scale_factor[1])
        else:
            sh_f = sw_f = float(scale_factor)
        H_out = int(np.floor(H * sh_f))
        W_out = int(np.floor(W * sw_f))

    out_dtype = x.dtype
    if out_dtype == jnp.bfloat16:
        compute_dtype, precision = jnp.bfloat16, None
    else:
        # TODO(synk): a mixed-precision dot (bf16 one-hot RHS, f32 LHS) would cut
        # the f32 MXU emulation passes ~2x on v7x; kept symmetric HIGHEST here
        # for guaranteed lowering (still bit-exact).
        compute_dtype, precision = jnp.float32, jax.lax.Precision.HIGHEST
    # TODO(synk): non-finite values (inf/nan) in non-selected columns pollute the
    # one-hot W matmul (0*inf=nan); an in-kernel lane gather would avoid it.
    # TODO(synk): integer inputs route through f32; |v| > 2^24 won't round-trip.
    if out_dtype == jnp.float32 or out_dtype == jnp.bfloat16:
        t_dtype = out_dtype
    else:
        t_dtype = jnp.float32

    sw = jnp.asarray(_col_one_hot(W, W_out), dtype=compute_dtype)   # (W, W_out)

    NC = N * C
    grp_h = max(8, 32 // max(1, jnp.dtype(out_dtype).itemsize))     # 8 f32 / 16 bf16
    h_plan = _build_h_plan(H, H_out, grp_h)

    # --- Generation-aware VMEM budgeting ----------------------------------- #
    try:
        vmem_cap = int(pltpu.get_tpu_info().vmem_capacity_bytes)
    except Exception:
        vmem_cap = 64 * 1024 * 1024       # v7x floor: safe everywhere
    rows_per_dot = 512
    budget = int(vmem_cap * 0.70)
    per_plane = (2 * _padded_vmem_bytes((H, W), x.dtype)            # in, dbl-buffered
                 + 2 * _padded_vmem_bytes((H_out, W_out), out_dtype)  # out, dbl-buffered
                 + _padded_vmem_bytes((H, W_out), t_dtype))           # scratch
    fixed = (2 * _padded_vmem_bytes((W, W_out), compute_dtype)        # one-hot (2 bufs)
             + _padded_vmem_bytes((rows_per_dot, W_out), jnp.float32)  # dot temp
             + (2 << 20))                                              # headroom
    bnc_vmem = max(1, (budget - fixed) // per_plane)
    bnc_grid = max(1, NC // 4)            # keep >= ~4 grid steps for pipelining/megacore
    bnc = int(max(1, min(bnc_vmem, bnc_grid, NC)))

    # (bnc*H) is the second-minor dim of the input block: it must be a multiple
    # of the sublane tile unless it equals the full array dim.
    sub_in = max(8, 32 // max(1, jnp.dtype(x.dtype).itemsize))
    m0 = sub_in // math.gcd(H, sub_in)
    if bnc < NC:
        bnc = max(m0, (bnc // m0) * m0)
        if bnc >= NC:
            bnc = NC

    # TODO(synk): if a single plane exceeds the VMEM budget (huge H_out*W_out,
    # notably on v7x's 64 MiB VMEM), an H_out-tile grid axis is still needed.
    grid = int(pl.cdiv(NC, bnc))
    est = fixed + bnc * per_plane
    vmem_limit = int(min(int(vmem_cap * 0.95),
                         max(int(vmem_cap * 0.80), est + (4 << 20))))

    x2d = x.reshape(NC * H, W)
    kernel = functools.partial(
        _upsample_kernel, bnc=bnc, H=H, W_out=W_out, h_plan=h_plan,
        compute_dtype=compute_dtype, precision=precision,
        rows_per_dot=rows_per_dot)

    out = pl.pallas_call(
        kernel,
        out_shape=jax.ShapeDtypeStruct((NC, H_out, W_out), out_dtype),
        grid_spec=pltpu.PrefetchScalarGridSpec(
            num_scalar_prefetch=0,
            grid=(grid,),
            in_specs=[
                pl.BlockSpec((bnc * H, W), lambda i: (i, 0)),
                pl.BlockSpec((W, W_out), lambda i: (0, 0)),   # constant -> fetched once
            ],
            out_specs=pl.BlockSpec((bnc, H_out, W_out), lambda i: (i, 0, 0)),
            scratch_shapes=[pltpu.VMEM((bnc * H, W_out), t_dtype)],
        ),
        compiler_params=pltpu.CompilerParams(
            dimension_semantics=("parallel",),
            vmem_limit_bytes=vmem_limit),
    )(x2d, sw)

    return out.reshape(N, C, H_out, W_out)


class MyUpsamplingNearest2d:
    """JAX/Pallas equivalent of the PyTorch MyUpsamplingNearest2d module."""

    def __init__(self, size=None, scale_factor=None):
        if size is None and scale_factor is None:
            raise ValueError("Upsampling size and scale_factor cannot be both None.")
        self.size = size
        self.scale_factor = scale_factor

    def __call__(self, x: jax.Array) -> jax.Array:
        return upsample_nearest_2d(x, self.size, self.scale_factor)


# --------------------------------------------------------------------------- #
# Self-test                                                                   #
# --------------------------------------------------------------------------- #
def _reference_nearest(x_np, H_out, W_out):
    ih = _nearest_src_indices(x_np.shape[2], H_out)
    iw = _nearest_src_indices(x_np.shape[3], W_out)
    return x_np[:, :, ih][:, :, :, iw]


if __name__ == "__main__":
    key = jax.random.PRNGKey(0)
    k1, k2 = jax.random.split(key)
    x = jax.random.normal(k1, (2, 4, 16, 16), dtype=jnp.float32)

    # scale_factor path (integer ratio), f32
    y = MyUpsamplingNearest2d(scale_factor=2)(x)
    jax.block_until_ready(y)
    assert y.shape == (2, 4, 32, 32)
    np.testing.assert_array_equal(np.asarray(y), _reference_nearest(np.asarray(x), 32, 32))

    # size path (non-integer ratio 16 -> 24)
    y2 = MyUpsamplingNearest2d(size=24)(x)
    jax.block_until_ready(y2)
    assert y2.shape == (2, 4, 24, 24)
    np.testing.assert_array_equal(np.asarray(y2), _reference_nearest(np.asarray(x), 24, 24))

    # bf16 path (native MXU dtype; selection is still exact)
    xb = x.astype(jnp.bfloat16)
    yb = MyUpsamplingNearest2d(scale_factor=2)(xb)
    jax.block_until_ready(yb)
    np.testing.assert_array_equal(
        np.asarray(yb).astype(np.float32),
        _reference_nearest(np.asarray(xb), 32, 32).astype(np.float32))

    # ragged N*C (exercises the cdiv grid tail block) + rectangular size + H downscale
    x3 = jax.random.normal(k2, (3, 3, 16, 16), dtype=jnp.float32)
    y3 = MyUpsamplingNearest2d(size=(10, 24))(x3)
    jax.block_until_ready(y3)
    assert y3.shape == (3, 3, 10, 24)
    np.testing.assert_array_equal(np.asarray(y3), _reference_nearest(np.asarray(x3), 10, 24))

    print("KERNEL_OK")
</pallas_src>

<mosaic_0001>
module attributes {stable_mosaic.version = 11 : i64} {
  func.func @_upsample_kernel(%arg0: i32, %arg1: memref<32x16xf32, #tpu.memory_space<vmem>>, %arg2: memref<16x32xf32, #tpu.memory_space<vmem>>, %arg3: memref<2x32x32xf32, #tpu.memory_space<vmem>>, %arg4: memref<32x32xf32, #tpu.memory_space<vmem>>) attributes {dimension_semantics = [#tpu.dimension_semantics<parallel>], iteration_bounds = array<i64: 4>, scalar_prefetch = 0 : i64, scratch_operands = 1 : i64, tpu.core_type = #tpu.core_type<tc>, window_params = [{transform_indices = @transform_0, window_bounds = array<i64: 32, 16>}, {pipeline_mode = #tpu.pipeline_mode<synchronous>, transform_indices = @transform_1, window_bounds = array<i64: 16, 32>}, {transform_indices = @transform_2, window_bounds = array<i64: 2, 32, 32>}]} {
    %c0 = arith.constant 0 : index
    %c0_0 = arith.constant 0 : index
    %0 = vector.load %arg2[%c0, %c0_0] : memref<16x32xf32, #tpu.memory_space<vmem>>, vector<16x32xf32>
    %c0_1 = arith.constant 0 : index
    %c0_2 = arith.constant 0 : index
    %1 = vector.load %arg1[%c0_1, %c0_2] : memref<32x16xf32, #tpu.memory_space<vmem>>, vector<32x16xf32>
    %cst = arith.constant dense<0.000000e+00> : vector<32x32xf32>
    %2 = tpu.matmul %1, %0, %cst {dimension_numbers = #tpu.dot_dimension_numbers<[1], [0], [0], [1], [0, 0, 1, 1], [], []>, precision = #tpu.contract_precision<fp32>} : vector<32x16xf32>, vector<16x32xf32>, vector<32x32xf32> -> vector<32x32xf32>
    %c0_3 = arith.constant 0 : index
    %c0_4 = arith.constant 0 : index
    %3 = vector.load %arg4[%c0_3, %c0_4] : memref<32x32xf32, #tpu.memory_space<vmem>>, vector<32x32xf32>
    tpu.vector_store %arg4[%c0_3, %c0_4], %2 {strides = array<i32>} : memref<32x32xf32, #tpu.memory_space<vmem>>, vector<32x32xf32>,
    %c0_i32 = arith.constant 0 : i32
    %c2_i32 = arith.constant 2 : i32
    %4 = arith.addi %c0_i32, %c2_i32 : i32
    %c1_i32 = arith.constant 1 : i32
    scf.for %arg5 = %c0_i32 to %4 step %c1_i32  : i32 {
      %c16_i32 = arith.constant 16 : i32
      %5 = arith.muli %arg5, %c16_i32 : i32
      %c0_i32_6 = arith.constant 0 : i32
      %6 = arith.addi %5, %c0_i32_6 : i32
      %7 = tpu.assume_multiple %6, 8 : i32
      %8 = arith.index_cast %7 : i32 to index
      %c0_7 = arith.constant 0 : index
      %9 = vector.load %arg4[%8, %c0_7] : memref<32x32xf32, #tpu.memory_space<vmem>>, vector<4x32xf32>
      %10 = tpu.iota {dimensions = array<i32: 0>} : vector<8x1xi32>
      %11 = vector.extract_strided_slice %9 {offsets = [0, 0], sizes = [1, 32], strides = [1, 1]} : vector<4x32xf32> to vector<1x32xf32>
      %12 = vector.shape_cast %11 : vector<1x32xf32> to vector<1x32xf32>
      %13 = vector.broadcast %12 : vector<1x32xf32> to vector<8x32xf32>
      %c2_i32_8 = arith.constant 2 : i32
      %14 = vector.broadcast %c2_i32_8 : i32 to vector<8x1xi32>
      %15 = arith.cmpi sge, %10, %14 : vector<8x1xi32>
      %16 = vector.extract_strided_slice %9 {offsets = [1, 0], sizes = [1, 32], strides = [1, 1]} : vector<4x32xf32> to vector<1x32xf32>
      %17 = vector.shape_cast %15 : vector<8x1xi1> to vector<8x1xi1>
      %18 = vector.broadcast %17 : vector<8x1xi1> to vector<8x32xi1>
      %19 = vector.shape_cast %16 : vector<1x32xf32> to vector<1x32xf32>
      %20 = vector.broadcast %19 : vector<1x32xf32> to vector<8x32xf32>
      %21 = arith.select %18, %20, %13 : vector<8x32xi1>, vector<8x32xf32>
      %c4_i32 = arith.constant 4 : i32
      %22 = vector.broadcast %c4_i32 : i32 to vector<8x1xi32>
      %23 = arith.cmpi sge, %10, %22 : vector<8x1xi32>
      %24 = vector.extract_strided_slice %9 {offsets = [2, 0], sizes = [1, 32], strides = [1, 1]} : vector<4x32xf32> to vector<1x32xf32>
      %25 = vector.shape_cast %23 : vector<8x1xi1> to vector<8x1xi1>
      %26 = vector.broadcast %25 : vector<8x1xi1> to vector<8x32xi1>
      %27 = vector.shape_cast %24 : vector<1x32xf32> to vector<1x32xf32>
      %28 = vector.broadcast %27 : vector<1x32xf32> to vector<8x32xf32>
      %29 = arith.select %26, %28, %21 : vector<8x32xi1>, vector<8x32xf32>
      %c6_i32 = arith.constant 6 : i32
      %30 = vector.broadcast %c6_i32 : i32 to vector<8x1xi32>
      %31 = arith.cmpi sge, %10, %30 : vector<8x1xi32>
      %32 = vector.extract_strided_slice %9 {offsets = [3, 0], sizes = [1, 32], strides = [1, 1]} : vector<4x32xf32> to vector<1x32xf32>
      %33 = vector.shape_cast %31 : vector<8x1xi1> to vector<8x1xi1>
      %34 = vector.broadcast %33 : vector<8x1xi1> to vector<8x32xi1>
      %35 = vector.shape_cast %32 : vector<1x32xf32> to vector<1x32xf32>
      %36 = vector.broadcast %35 : vector<1x32xf32> to vector<8x32xf32>
      %37 = arith.select %34, %36, %29 : vector<8x32xi1>, vector<8x32xf32>
      %38 = arith.index_cast %arg5 : i32 to index
      %c0_9 = arith.constant 0 : index
      %c0_10 = arith.constant 0 : index
      %39 = vector.load %arg3[%38, %c0_9, %c0_10] : memref<2x32x32xf32, #tpu.memory_space<vmem>>, vector<1x8x32xf32>
      %40 = vector.shape_cast %39 : vector<1x8x32xf32> to vector<8x32xf32>
      %41 = vector.shape_cast %37 : vector<8x32xf32> to vector<1x8x32xf32>
      tpu.vector_store %arg3[%38, %c0_9, %c0_10], %41 {strides = array<i32>} : memref<2x32x32xf32, #tpu.memory_space<vmem>>, vector<1x8x32xf32>,
      %c4_i32_11 = arith.constant 4 : i32
      %42 = arith.addi %5, %c4_i32_11 : i32
      %43 = arith.index_cast %42 : i32 to index
      %c0_12 = arith.constant 0 : index
      %44 = vector.load %arg4[%43, %c0_12] : memref<32x32xf32, #tpu.memory_space<vmem>>, vector<4x32xf32>
      %45 = tpu.iota {dimensions = array<i32: 0>} : vector<8x1xi32>
      %46 = vector.extract_strided_slice %44 {offsets = [0, 0], sizes = [1, 32], strides = [1, 1]} : vector<4x32xf32> to vector<1x32xf32>
      %47 = vector.shape_cast %46 : vector<1x32xf32> to vector<1x32xf32>
      %48 = vector.broadcast %47 : vector<1x32xf32> to vector<8x32xf32>
      %c2_i32_13 = arith.constant 2 : i32
      %49 = vector.broadcast %c2_i32_13 : i32 to vector<8x1xi32>
      %50 = arith.cmpi sge, %45, %49 : vector<8x1xi32>
      %51 = vector.extract_strided_slice %44 {offsets = [1, 0], sizes = [1, 32], strides = [1, 1]} : vector<4x32xf32> to vector<1x32xf32>
      %52 = vector.shape_cast %50 : vector<8x1xi1> to vector<8x1xi1>
      %53 = vector.broadcast %52 : vector<8x1xi1> to vector<8x32xi1>
      %54 = vector.shape_cast %51 : vector<1x32xf32> to vector<1x32xf32>
      %55 = vector.broadcast %54 : vector<1x32xf32> to vector<8x32xf32>
      %56 = arith.select %53, %55, %48 : vector<8x32xi1>, vector<8x32xf32>
      %c4_i32_14 = arith.constant 4 : i32
      %57 = vector.broadcast %c4_i32_14 : i32 to vector<8x1xi32>
      %58 = arith.cmpi sge, %45, %57 : vector<8x1xi32>
      %59 = vector.extract_strided_slice %44 {offsets = [2, 0], sizes = [1, 32], strides = [1, 1]} : vector<4x32xf32> to vector<1x32xf32>
      %60 = vector.shape_cast %58 : vector<8x1xi1> to vector<8x1xi1>
      %61 = vector.broadcast %60 : vector<8x1xi1> to vector<8x32xi1>
      %62 = vector.shape_cast %59 : vector<1x32xf32> to vector<1x32xf32>
      %63 = vector.broadcast %62 : vector<1x32xf32> to vector<8x32xf32>
      %64 = arith.select %61, %63, %56 : vector<8x32xi1>, vector<8x32xf32>
      %c6_i32_15 = arith.constant 6 : i32
      %65 = vector.broadcast %c6_i32_15 : i32 to vector<8x1xi32>
      %66 = arith.cmpi sge, %45, %65 : vector<8x1xi32>
      %67 = vector.extract_strided_slice %44 {offsets = [3, 0], sizes = [1, 32], strides = [1, 1]} : vector<4x32xf32> to vector<1x32xf32>
      %68 = vector.shape_cast %66 : vector<8x1xi1> to vector<8x1xi1>
      %69 = vector.broadcast %68 : vector<8x1xi1> to vector<8x32xi1>
      %70 = vector.shape_cast %67 : vector<1x32xf32> to vector<1x32xf32>
      %71 = vector.broadcast %70 : vector<1x32xf32> to vector<8x32xf32>
      %72 = arith.select %69, %71, %64 : vector<8x32xi1>, vector<8x32xf32>
      %73 = arith.index_cast %arg5 : i32 to index
      %c8 = arith.constant 8 : index
      %c0_16 = arith.constant 0 : index
      %74 = vector.load %arg3[%73, %c8, %c0_16] : memref<2x32x32xf32, #tpu.memory_space<vmem>>, vector<1x8x32xf32>
      %75 = vector.shape_cast %74 : vector<1x8x32xf32> to vector<8x32xf32>
      %76 = vector.shape_cast %72 : vector<8x32xf32> to vector<1x8x32xf32>
      tpu.vector_store %arg3[%73, %c8, %c0_16], %76 {strides = array<i32>} : memref<2x32x32xf32, #tpu.memory_space<vmem>>, vector<1x8x32xf32>,
      %c8_i32 = arith.constant 8 : i32
      %77 = arith.addi %5, %c8_i32 : i32
      %78 = tpu.assume_multiple %77, 8 : i32
      %79 = arith.index_cast %78 : i32 to index
      %c0_17 = arith.constant 0 : index
      %80 = vector.load %arg4[%79, %c0_17] : memref<32x32xf32, #tpu.memory_space<vmem>>, vector<4x32xf32>
      %81 = tpu.iota {dimensions = array<i32: 0>} : vector<8x1xi32>
      %82 = vector.extract_strided_slice %80 {offsets = [0, 0], sizes = [1, 32], strides = [1, 1]} : vector<4x32xf32> to vector<1x32xf32>
      %83 = vector.shape_cast %82 : vector<1x32xf32> to vector<1x32xf32>
      %84 = vector.broadcast %83 : vector<1x32xf32> to vector<8x32xf32>
      %c2_i32_18 = arith.constant 2 : i32
      %85 = vector.broadcast %c2_i32_18 : i32 to vector<8x1xi32>
      %86 = arith.cmpi sge, %81, %85 : vector<8x1xi32>
      %87 = vector.extract_strided_slice %80 {offsets = [1, 0], sizes = [1, 32], strides = [1, 1]} : vector<4x32xf32> to vector<1x32xf32>
      %88 = vector.shape_cast %86 : vector<8x1xi1> to vector<8x1xi1>
      %89 = vector.broadcast %88 : vector<8x1xi1> to vector<8x32xi1>
      %90 = vector.shape_cast %87 : vector<1x32xf32> to vector<1x32xf32>
      %91 = vector.broadcast %90 : vector<1x32xf32> to vector<8x32xf32>
      %92 = arith.select %89, %91, %84 : vector<8x32xi1>, vector<8x32xf32>
      %c4_i32_19 = arith.constant 4 : i32
      %93 = vector.broadcast %c4_i32_19 : i32 to vector<8x1xi32>
      %94 = arith.cmpi sge, %81, %93 : vector<8x1xi32>
      %95 = vector.extract_strided_slice %80 {offsets = [2, 0], sizes = [1, 32], strides = [1, 1]} : vector<4x32xf32> to vector<1x32xf32>
      %96 = vector.shape_cast %94 : vector<8x1xi1> to vector<8x1xi1>
      %97 = vector.broadcast %96 : vector<8x1xi1> to vector<8x32xi1>
      %98 = vector.shape_cast %95 : vector<1x32xf32> to vector<1x32xf32>
      %99 = vector.broadcast %98 : vector<1x32xf32> to vector<8x32xf32>
      %100 = arith.select %97, %99, %92 : vector<8x32xi1>, vector<8x32xf32>
      %c6_i32_20 = arith.constant 6 : i32
      %101 = vector.broadcast %c6_i32_20 : i32 to vector<8x1xi32>
      %102 = arith.cmpi sge, %81, %101 : vector<8x1xi32>
      %103 = vector.extract_strided_slice %80 {offsets = [3, 0], sizes = [1, 32], strides = [1, 1]} : vector<4x32xf32> to vector<1x32xf32>
      %104 = vector.shape_cast %102 : vector<8x1xi1> to vector<8x1xi1>
      %105 = vector.broadcast %104 : vector<8x1xi1> to vector<8x32xi1>
      %106 = vector.shape_cast %103 : vector<1x32xf32> to vector<1x32xf32>
      %107 = vector.broadcast %106 : vector<1x32xf32> to vector<8x32xf32>
      %108 = arith.select %105, %107, %100 : vector<8x32xi1>, vector<8x32xf32>
      %109 = arith.index_cast %arg5 : i32 to index
      %c16 = arith.constant 16 : index
      %c0_21 = arith.constant 0 : index
      %110 = vector.load %arg3[%109, %c16, %c0_21] : memref<2x32x32xf32, #tpu.memory_space<vmem>>, vector<1x8x32xf32>
      %111 = vector.shape_cast %110 : vector<1x8x32xf32> to vector<8x32xf32>
      %112 = vector.shape_cast %108 : vector<8x32xf32> to vector<1x8x32xf32>
      tpu.vector_store %arg3[%109, %c16, %c0_21], %112 {strides = array<i32>} : memref<2x32x32xf32, #tpu.memory_space<vmem>>, vector<1x8x32xf32>,
      %c12_i32 = arith.constant 12 : i32
      %113 = arith.addi %5, %c12_i32 : i32
      %114 = arith.index_cast %113 : i32 to index
      %c0_22 = arith.constant 0 : index
      %115 = vector.load %arg4[%114, %c0_22] : memref<32x32xf32, #tpu.memory_space<vmem>>, vector<4x32xf32>
      %116 = tpu.iota {dimensions = array<i32: 0>} : vector<8x1xi32>
      %117 = vector.extract_strided_slice %115 {offsets = [0, 0], sizes = [1, 32], strides = [1, 1]} : vector<4x32xf32> to vector<1x32xf32>
      %118 = vector.shape_cast %117 : vector<1x32xf32> to vector<1x32xf32>
      %119 = vector.broadcast %118 : vector<1x32xf32> to vector<8x32xf32>
      %c2_i32_23 = arith.constant 2 : i32
      %120 = vector.broadcast %c2_i32_23 : i32 to vector<8x1xi32>
      %121 = arith.cmpi sge, %116, %120 : vector<8x1xi32>
      %122 = vector.extract_strided_slice %115 {offsets = [1, 0], sizes = [1, 32], strides = [1, 1]} : vector<4x32xf32> to vector<1x32xf32>
      %123 = vector.shape_cast %121 : vector<8x1xi1> to vector<8x1xi1>
      %124 = vector.broadcast %123 : vector<8x1xi1> to vector<8x32xi1>
      %125 = vector.shape_cast %122 : vector<1x32xf32> to vector<1x32xf32>
      %126 = vector.broadcast %125 : vector<1x32xf32> to vector<8x32xf32>
      %127 = arith.select %124, %126, %119 : vector<8x32xi1>, vector<8x32xf32>
      %c4_i32_24 = arith.constant 4 : i32
      %128 = vector.broadcast %c4_i32_24 : i32 to vector<8x1xi32>
      %129 = arith.cmpi sge, %116, %128 : vector<8x1xi32>
      %130 = vector.extract_strided_slice %115 {offsets = [2, 0], sizes = [1, 32], strides = [1, 1]} : vector<4x32xf32> to vector<1x32xf32>
      %131 = vector.shape_cast %129 : vector<8x1xi1> to vector<8x1xi1>
      %132 = vector.broadcast %131 : vector<8x1xi1> to vector<8x32xi1>
      %133 = vector.shape_cast %130 : vector<1x32xf32> to vector<1x32xf32>
      %134 = vector.broadcast %133 : vector<1x32xf32> to vector<8x32xf32>
      %135 = arith.select %132, %134, %127 : vector<8x32xi1>, vector<8x32xf32>
      %c6_i32_25 = arith.constant 6 : i32
      %136 = vector.broadcast %c6_i32_25 : i32 to vector<8x1xi32>
      %137 = arith.cmpi sge, %116, %136 : vector<8x1xi32>
      %138 = vector.extract_strided_slice %115 {offsets = [3, 0], sizes = [1, 32], strides = [1, 1]} : vector<4x32xf32> to vector<1x32xf32>
      %139 = vector.shape_cast %137 : vector<8x1xi1> to vector<8x1xi1>
      %140 = vector.broadcast %139 : vector<8x1xi1> to vector<8x32xi1>
      %141 = vector.shape_cast %138 : vector<1x32xf32> to vector<1x32xf32>
      %142 = vector.broadcast %141 : vector<1x32xf32> to vector<8x32xf32>
      %143 = arith.select %140, %142, %135 : vector<8x32xi1>, vector<8x32xf32>
      %144 = arith.index_cast %arg5 : i32 to index
      %c24 = arith.constant 24 : index
      %c0_26 = arith.constant 0 : index
      %145 = vector.load %arg3[%144, %c24, %c0_26] : memref<2x32x32xf32, #tpu.memory_space<vmem>>, vector<1x8x32xf32>
      %146 = vector.shape_cast %145 : vector<1x8x32xf32> to vector<8x32xf32>
      %147 = vector.shape_cast %143 : vector<8x32xf32> to vector<1x8x32xf32>
      tpu.vector_store %arg3[%144, %c24, %c0_26], %147 {strides = array<i32>} : memref<2x32x32xf32, #tpu.memory_space<vmem>>, vector<1x8x32xf32>,
    }
    %c2_i32_5 = arith.constant 2 : i32
    return
  }
  func.func @transform_0(%arg0: i32) -> (i32, i32) {
    %c0_i32 = arith.constant 0 : i32
    %c0_i32_0 = arith.constant 0 : i32
    return %arg0, %c0_i32 : i32, i32
  }
  func.func @transform_1(%arg0: i32) -> (i32, i32) {
    %c0_i32 = arith.constant 0 : i32
    %c0_i32_0 = arith.constant 0 : i32
    %c0_i32_1 = arith.constant 0 : i32
    return %c0_i32, %c0_i32_0 : i32, i32
  }
  func.func @transform_2(%arg0: i32) -> (i32, i32, i32) {
    %c0_i32 = arith.constant 0 : i32
    %c0_i32_0 = arith.constant 0 : i32
    %c0_i32_1 = arith.constant 0 : i32
    return %arg0, %c0_i32, %c0_i32_0 : i32, i32, i32
  }
}

</mosaic_0001>

<bundles_post_ra>
// kernel: tpu_custom_call.1
= control target key start
LH: loop header
LB: loop body
LE: loop exit
PB: predicated region body
PF: predicated region fallthrough
CT: control target
= control target key end

     0   :  { %7 = vsyncpa [#allocation4], 0  ;;  %s1399_s0 = inlined_call_operand.vmem [shape: f32[128,16], index: 0, kind: input, shape index: {}]   ;;  %s1400_s1 = inlined_call_operand.vmem [shape: f32[16,32], index: 1, kind: input, shape index: {}]   ;;  %s1401_s2 = inlined_call_operand.hbm [shape: f32[8,32,32], index: 2, kind: output, shape index: {}]  }
   0x1   :  { %9 = vsyncpa [#allocation4 + $0x1], 0  ;;  %s1219_s9 = smov 0   ;;  %s1221_s10 = smov 0  }
   0x2   :  { %s1223_s11 = smov 0   ;;  %s1225_s12 = smov 0  }
   0x3 LB: > { %s1240_s13 = sadd.s32 4294967295, %s1195_s12   ;;  %s963_s14 = sadd.s32 4294967294, %s1195_s12   ;;  %s1195_s12 = sphi %s1225_s12, %s1407_s12   ;;  %s1191_s11 = sphi %s1223_s11, %s1406_s11   ;;  %s1187_s10 = sphi %s1221_s10, %s1405_s10   ;;  %s1183_s9 = sphi %s1219_s9, %s1404_s9  }
   0x4   : > { %s1244_s15 = sadd.s32 1, %s1195_s12   ;;  %s69_s16 = sadd.s32 1, %s1191_s11 }
   0x5   : > { %s66_s17 = ssub.s32 %s1195_s12, %s1244_s15  ;;  %p79_p0 = scmp.ne.s32.totalorder %s1191_s11, %s1187_s10 }
   0x6   : > { %p67_p1 = scmp.eq.s32.totalorder %s66_s17, 0  ;;  %p80_p2 = scmp.eq.s32.totalorder %s1240_s13, 3 }
   0x7   : > { %p85_p3 = scmp.ne.s32.totalorder %s1187_s10, %s1183_s9  ;;  %p86_p4 = scmp.eq.s32.totalorder %s963_s14, 3 }
   0x8   : > { %s1255_s18 = scalar_select %p67_p1, %s1191_s11, %s69_s16  }
   0x9   : > { %p1257_p5 = por %p80_p2, %p79_p0  ;;  %p1261_p6 = por %p86_p4, %p85_p3 }
   0xa   : > { %p966_p7 = scmp.ge.s32.totalorder %s1195_s12, 1  ;;  %p116_p8 = scmp.lt.s32.totalorder %s1195_s12, 5 }
   0xc   : > { %p117_p9 = pnand %p966_p7, %p116_p8 }
   0xd   : > { %s135_s21 = sand.u32 (!%p117_p9), 1, %s1187_s10   ;;  %s968_s26 = sshll.u32 (!%p117_p9), %s1240_s13, 2 }
   0xe   : > { %120 = sbr.rel (%p117_p9) target bundleno = 289 (0x121), region = 28  ;;  %s1277_s27 = sshll.u32 (!%p117_p9), %s135_s21, 6 }
   0xf   : > { %p139_p10 = scmp.lt.s32.totalorder (!%p117_p9), %s968_s26, 15  ;;  %s137_s4 = scalar_lea.vmem (!%p117_p9), [#allocation3], %s1277_s27 }
  0x10   : > { %s1319_s5 = smov (!%p117_p9), 0  }
  0x13   : > { %v146_v0 = vld [vmem:[%s1400_s1 + $0x8] sm:$0xff]  ;;  %v145_v1 = vld [vmem:[%s1400_s1] sm:$0xff]  ;;  %s1409_s26 = smov (!%p139_p10, %s968_s26), 15  ;;  %vm151_vm0 = vcmask 130048   ;;  %vm752_vm1 = vcmask 261120  }
  0x14   : > { %v1279_v2 = vand.u32 4294901760, %v146_v0  ;;  %v1281_v3 = vand.u32 4294901760, %v145_v1  ;;  %s969_s28 = sshll.u32 %s1409_s26, 3 }
  0x15   : > { %s142_s3 = scalar_lea.vmem %s1399_s0, %s969_s28 }
  0x16   : > { %1022 = vmatprep.subr.mxu0 %v1279_v2  ;;  %v301_v4 = vsub.f32 %v146_v0, %v1279_v2  ;;  %v308_v5 = vsub.f32 %v145_v1, %v1281_v3  ;;  %v147_v10 = vld [vmem:[%s142_s3] sm:$0xff]  ;;  %v148_v11 = vld [vmem:[%s142_s3 + $0x8] sm:$0xff]  ;;  %v149_v12 = vld [vmem:[%s142_s3 + $0x10] sm:$0xff] }
  0x17   : > { %1023 = vmatpush3.msra.mxu0 %v1279_v2  ;;  %v153_v13 = vsel %vm151_vm0, %v147_v10, 0  ;;  %v156_v14 = vsel %vm151_vm0, %v148_v11, 0  ;;  %v159_v15 = vsel %vm151_vm0, %v149_v12, 0  ;;  %v150_v16 = vld [vmem:[%s142_s3 + $0x18] sm:$0xff] }
  0x18   : > { %v1287_v6 = vand.u32 4294901760, %v301_v4  ;;  %1024 = vmatprep.subr.mxu0 %v1281_v3  ;;  %v1290_v7 = vand.u32 4294901760, %v308_v5  ;;  %v231_v19 = vand.u32 4294901760, %v153_v13  ;;  %v241_v20 = vand.u32 4294901760, %v156_v14 }
  0x19   : > { %1025 = vmatpush3.msra.mxu0 %v1281_v3  ;;  %v251_v21 = vand.u32 4294901760, %v159_v15  ;;  %v162_v22 = vsel %vm151_vm0, %v150_v16, 0 }
  0x1a   : > { %v303_v8 = vsub.f32 %v301_v4, %v1287_v6  ;;  %v310_v9 = vsub.f32 %v308_v5, %v1290_v7  ;;  %1042 = vmatprep.subr.mxu0 %v301_v4  ;;  %v232_v23 = vsub.f32 %v153_v13, %v231_v19  ;;  %1036 = vmatprep.mubr.f32.mxu1 %v231_v19  ;;  %v261_v25 = vand.u32 4294901760, %v162_v22 }
  0x1b   : > { %v242_v24 = vsub.f32 %v156_v14, %v241_v20  ;;  %v252_v26 = vsub.f32 %v159_v15, %v251_v21 }
  0x1c   : > { %v304_v17 = vand.u32 4294901760, %v303_v8  ;;  %v311_v18 = vand.u32 4294901760, %v310_v9  ;;  %v233_v27 = vand.u32 4294901760, %v232_v23  ;;  %v262_v29 = vsub.f32 %v162_v22, %v261_v25 }
  0x1d   : > { %v243_v28 = vand.u32 4294901760, %v242_v24  ;;  %v253_v30 = vand.u32 4294901760, %v252_v26 }
  0x1e   : > { %1032 = vmatprep.subr.mxu1 %v304_v17  ;;  %v234_v31 = vsub.f32 %v232_v23, %v233_v27  ;;  %v263_v33 = vand.u32 4294901760, %v262_v29 }
  0x1f   : > { %1033 = vmatpush3.msra.mxu1 %v304_v17  ;;  %v244_v32 = vsub.f32 %v242_v24, %v243_v28  ;;  %v254_v34 = vsub.f32 %v252_v26, %v253_v30 }
  0x20   : > { %1034 = vmatprep.subr.mxu1 %v311_v18  ;;  %v235_v35 = vand.u32 4294901760, %v234_v31  ;;  %v264_v37 = vsub.f32 %v262_v29, %v263_v33 }
  0x21   : > { %1035 = vmatpush3.msra.mxu1 %v311_v18  ;;  %v245_v36 = vand.u32 4294901760, %v244_v32  ;;  %v255_v38 = vand.u32 4294901760, %v254_v34 }
  0x22   : > { %1037 = vmatmul.mubr.f32.vlgmr.msra.gmra.mxu1 %v241_v20  ;;  %1052 = vmatprep.subr.mxu1 %v1279_v2  ;;  %v265_v39 = vand.u32 4294901760, %v264_v37 }
  0x23   : > { %1053 = vmatpush3.msra.mxu1 %v1279_v2  ;;  %1039 = vmatprep.mubr.f32.mxu1 %v251_v21 }
  0x24   : > { %1054 = vmatprep.subr.mxu1 %v1281_v3  ;;  %1026 = vmatprep.mubr.f32.mxu0 %v235_v35 }
  0x25   : > { %1055 = vmatpush3.msra.mxu1 %v1281_v3  ;;  %1027 = vmatmul.mubr.f32.vlgmr.msra.gmra.mxu0 %v245_v36 }
  0x26   : > { %1040 = vmatmul.mubr.f32.gmra.mxu1 %v261_v25  ;;  %1043 = vmatpush3.msra.mxu0 %v301_v4 }
  0x27   : > { %1056 = vmatprep.mubr.f32.mxu1 %v233_v27  ;;  %1029 = vmatprep.mubr.f32.mxu0 %v255_v38 }
  0x28   : > { %1044 = vmatprep.subr.mxu0 %v308_v5  ;;  %1072 = vmatprep.subr.mxu1 %v1279_v2 }
  0x29   : > { %1045 = vmatpush3.msra.mxu0 %v308_v5 }
  0x2a   : > { %1057 = vmatmul.mubr.f32.vlgmr.msra.gmra.mxu1 %v243_v28  ;;  %1030 = vmatmul.mubr.f32.gmra.mxu0 %v265_v39 }
  0x2b   : > { %1062 = vmatprep.subr.mxu0 %v1287_v6  ;;  %1046 = vmatprep.mubr.f32.mxu0 %v232_v23 }
  0x2c   : > { %1073 = vmatpush3.msra.mxu1 %v1279_v2  ;;  %1059 = vmatprep.mubr.f32.mxu1 %v253_v30 }
  0x2d   : > { %1074 = vmatprep.subr.mxu1 %v1281_v3 }
  0x2e   : > { %1060 = vmatmul.mubr.f32.gmra.mxu1 %v263_v33  ;;  %1047 = vmatmul.mubr.f32.vlgmr.msra.gmra.mxu0 %v242_v24 }
  0x2f   : > { %1075 = vmatpush3.msra.mxu1 %v1281_v3  ;;  %1063 = vmatpush3.msra.mxu0 %v1287_v6 }
  0x30   : > { %1049 = vmatprep.mubr.f32.mxu0 %v252_v26  ;;  %1064 = vmatprep.subr.mxu0 %v1290_v7 }
  0x31   : > { %1076 = vmatprep.mubr.f32.mxu1 %v231_v19  ;;  %1065 = vmatpush3.msra.mxu0 %v1290_v7 }
  0x32   : > { %1077 = vmatmul.mubr.f32.vlgmr.msra.gmra.mxu1 %v241_v20  ;;  %1050 = vmatmul.mubr.f32.gmra.mxu0 %v262_v29 }
  0x33   : > { %1079 = vmatprep.mubr.f32.mxu1 %v251_v21  ;;  %1066 = vmatprep.mubr.f32.mxu0 %v231_v19 }
  0x36   : > { %1080 = vmatmul.mubr.f32.gmra.mxu1 %v261_v25  ;;  %1067 = vmatmul.mubr.f32.vlgmr.msra.gmra.mxu0 %v241_v20 }
  0x37   : > { %1069 = vmatprep.mubr.f32.mxu0 %v251_v21 }
  0x3a   : > { %1070 = vmatmul.mubr.f32.gmra.mxu0 %v261_v25 }
  0xe2   : > { %v1038_v40 = vpop.f32.mrf.mxu1 }
  0xe4   : > { %v348_v41 = vpop.f32.mrf.mxu1 }
  0xe5   : > { %v1028_v43 = vpop.f32.mrf.mxu0 }
  0xe6   : > { %v1041_v42 = vpop.f32.mrf.mxu1  ;;  %v355_v52 = vadd.f32 %v1038_v40, %v1028_v43 }
  0xe7   : > { %v237_v45 = vpop.f32.mrf.mxu0 }
  0xe8   : > { %v360_v44 = vpop.f32.mrf.mxu1  ;;  %v349_v55 = vadd.f32 %v348_v41, %v237_v45 }
  0xea   : > { %v1058_v46 = vpop.f32.mrf.mxu1  ;;  %v1031_v47 = vpop.f32.mrf.mxu0 }
  0xeb   : > { %v367_v59 = vadd.f32 %v1041_v42, %v1031_v47 }
  0xec   : > { %v538_v48 = vpop.f32.mrf.mxu1  ;;  %v257_v49 = vpop.f32.mrf.mxu0 }
  0xed   : > { %v361_v62 = vadd.f32 %v360_v44, %v257_v49 }
  0xee   : > { %v1061_v50 = vpop.f32.mrf.mxu1  ;;  %v1048_v51 = vpop.f32.mrf.mxu0 }
  0xef   : > { %v450_v56 = vadd.f32 %v1048_v51, %v355_v52 }
  0xf0   : > { %v554_v53 = vpop.f32.mrf.mxu1  ;;  %v442_v54 = vpop.f32.mrf.mxu0 }
  0xf1   : > { %v443_v60 = vadd.f32 %v442_v54, %v349_v55  ;;  %v547_v63 = vadd.f32 %v1058_v46, %v450_v56 }
  0xf2   : > { %v1051_v57 = vpop.f32.mrf.mxu0  ;;  %v1078_v58 = vpop.f32.mrf.mxu1 }
  0xf3   : > { %v464_v0 = vadd.f32 %v1051_v57, %v367_v59  ;;  %v539_v3 = vadd.f32 %v538_v48, %v443_v60 }
  0xf4   : > { %v456_v61 = vpop.f32.mrf.mxu0  ;;  %v730_v2 = vpop.f32.mrf.mxu1 }
  0xf5   : > { %v457_v4 = vadd.f32 %v456_v61, %v361_v62  ;;  %v563_v7 = vadd.f32 %v1061_v50, %v464_v0 }
  0xf6   : > { %v1068_v1 = vpop.f32.mrf.mxu0  ;;  %v1081_v11 = vpop.f32.mrf.mxu1 }
  0xf7   : > { %v646_v5 = vadd.f32 %v1068_v1, %v547_v63  ;;  %v555_v12 = vadd.f32 %v554_v53, %v457_v4 }
  0xf8   : > { %v639_v6 = vpop.f32.mrf.mxu0  ;;  %v742_v18 = vpop.f32.mrf.mxu1 }
  0xf9   : > { %v737_v8 = vadd.f32 %v1078_v58, %v646_v5  ;;  %v640_v9 = vadd.f32 %v639_v6, %v539_v3 }
  0xfa   : > { %v1071_v10 = vpop.f32.mrf.mxu0 }
  0xfb   : > { %754 = vst.msk [vmem:[#allocation2 + $0x8] sm:$0xff] %vm752_vm1, %v737_v8  ;;  %v731_v13 = vadd.f32 %v730_v2, %v640_v9  ;;  %v658_v14 = vadd.f32 %v1071_v10, %v563_v7 }
  0xfc   : > { %v651_v15 = vpop.f32.mrf.mxu0 }
  0xfd   : > { %753 = vst.msk [vmem:[#allocation2] sm:$0xff] %vm752_vm1, %v731_v13  ;;  %v749_v16 = vadd.f32 %v1081_v11, %v658_v14  ;;  %v652_v17 = vadd.f32 %v651_v15, %v555_v12 }
  0xff   : > { %756 = vst.msk [vmem:[#allocation2 + $0x18] sm:$0xff] %vm752_vm1, %v749_v16  ;;  %v743_v19 = vadd.f32 %v742_v18, %v652_v17 }
 0x101   : > { %755 = vst.msk [vmem:[#allocation2 + $0x10] sm:$0xff] %vm752_vm1, %v743_v19 }
 0x102 LB: >> { %v766_v20 = vlaneseq  ;;  %s970_s6 = sshll.u32 %s1199_s5, 4  ;;  %s971_s8 = sshll.u32 %s1199_s5, 5  ;;  %s1199_s5 = sphi %s1319_s5, %s762_s5  }
 0x103   : >> { %s764_s7 = scalar_lea.vmem [#allocation2], %s970_s6  ;;  %s797_s14 = scalar_lea.vmem %s137_s4, %s971_s8 [#allocation3] }
 0x104   : >> { %v767_v21 = vshrl.u32 %v766_v20, 7  ;;  %s762_s5 = sadd.s32 1, %s1199_s5  }
 0x105   : >> { %p759_p11 = scmp.ge.s32.totalorder %s762_s5, 2  }
 0x106   : >> { %v770_v23 = vsub.s32 0, %v767_v21  ;;  %vm772_vm2 = vcmp.ge.s32.totalorder %v767_v21, 2  ;;  %v777_v24 = vsub.s32 1, %v767_v21  ;;  %vm780_vm3 = vcmp.ge.s32.totalorder %v767_v21, 4  ;;  %s985_s16 = sshll.u32 (%p759_p11), %s1240_s13, 10  ;;  %s883_s24 = sshll.u32 (%p759_p11), %s137_s4, 4  ;;  %s1355_s24 = int_to_ptr.vmem [resolvable:$true] %s883_s24 }
 0x107   : >> { %v785_v25 = vsub.s32 2, %v767_v21  ;;  %vm788_vm4 = vcmp.ge.s32.totalorder %v767_v21, 6  ;;  %v793_v26 = vsub.s32 3, %v767_v21  ;;  %s1351_s23 = scalar_lea.hbm (%p759_p11), %s1401_s2, %s985_s16  ;;  %s1359_s25 = scalar_lea.sflag (%p759_p11), [#allocation4], %s135_s21 }
 0x108   : >> { %v765_v22 = vld [vmem:[%s764_s7] sm:$0xf]  ;;  %v973_v27 = vld [vmem:[%s764_s7 + $0x4] sm:$0xf]  ;;  %v975_v32 = vld [vmem:[%s764_s7 + $0x8] sm:$0xf] }
 0x109   : >> { %v771_v28 = vrot.slane %v765_v22, %v770_v23  ;;  %v778_v29 = vrot.slane %v765_v22, %v777_v24  ;;  %v805_v30 = vrot.slane %v973_v27, %v770_v23  ;;  %v809_v31 = vrot.slane %v973_v27, %v777_v24  ;;  %v977_v37 = vld [vmem:[%s764_s7 + $0xc] sm:$0xf]  ;;  %s1131_s26 = scalar_lea.vmem (%p759_p11), %s1355_s24, 1024  ;;  %s1201_s13 = smov (%p759_p11), [#allocation3]  }
 0x10a   : >> { %v786_v33 = vrot.slane %v765_v22, %v785_v25  ;;  %v794_v34 = vrot.slane %v765_v22, %v793_v26  ;;  %v814_v35 = vrot.slane %v973_v27, %v785_v25  ;;  %v819_v36 = vrot.slane %v973_v27, %v793_v26  ;;  %p1132_p12 = scmp.ne.s32.totalorder (%p759_p11), %s1355_s24, %s1131_s26  ;;  %s1135_s28 = sshll.u32 (%p759_p11), %s1201_s13, 4  ;;  %s1136_s28 = int_to_ptr.vmem [resolvable:$false] %s1135_s28 }
 0x10b   : >> { %v779_v38 = vsel %vm772_vm2, %v778_v29, %v771_v28  ;;  %v810_v39 = vsel %vm772_vm2, %v809_v31, %v805_v30  ;;  %v828_v40 = vrot.slane %v975_v32, %v770_v23  ;;  %v832_v41 = vrot.slane %v975_v32, %v777_v24  ;;  %s1137_s29 = scalar_lea.vmem (%p759_p11), %s1136_s28, 2048  ;;  %p1138_p1 = scmp.lt.s32.totalorder (%p759_p11), %s1355_s24, %s1136_s28 }
 0x10c   : >> { %v787_v42 = vsel %vm780_vm3, %v786_v33, %v779_v38  ;;  %v815_v43 = vsel %vm780_vm3, %v814_v35, %v810_v39  ;;  %v837_v44 = vrot.slane %v975_v32, %v785_v25  ;;  %v842_v45 = vrot.slane %v975_v32, %v793_v26  ;;  %p1133_p13 = pnand (%p759_p11), %p1132_p12, %p1257_p5  ;;  %p1139_p2 = scmp.lt.s32.totalorder (%p759_p11), %s1137_s29, %s1131_s26 }
 0x10d   : >> { %v795_v46 = vsel %vm788_vm4, %v794_v34, %v787_v42  ;;  %v820_v47 = vsel %vm788_vm4, %v819_v36, %v815_v43  ;;  %v833_v48 = vsel %vm772_vm2, %v832_v41, %v828_v40  ;;  %v851_v49 = vrot.slane %v977_v37, %v770_v23 }
 0x10e   : >> { %798 = vst.msk [vmem:[%s797_s14] sm:$0xff] %vm752_vm1, %v795_v46  ;;  %821 = vst.msk [vmem:[%s797_s14 + $0x8] sm:$0xff] %vm752_vm1, %v820_v47  ;;  %v838_v50 = vsel %vm780_vm3, %v837_v44, %v833_v48  ;;  %v855_v51 = vrot.slane %v977_v37, %v777_v24  ;;  %v860_v52 = vrot.slane %v977_v37, %v785_v25  ;;  %p1134_p0 = pneg (%p759_p11), %p1133_p13  ;;  %p1140_p3 = por (%p759_p11), %p1139_p2, %p1138_p1 }
 0x10f   : >> { %v865_v53 = vrot.slane %v977_v37, %v793_v26  ;;  %v843_v54 = vsel %vm788_vm4, %v842_v45, %v838_v50  ;;  %761 = sbr.rel (!%p759_p11) target bundleno = 258 (0x102), region = 75 }
 0x110   : >> { %844 = vst.msk [vmem:[%s797_s14 + $0x10] sm:$0xff] %vm752_vm1, %v843_v54  ;;  %v856_v55 = vsel %vm772_vm2, %v855_v51, %v851_v49  ;;  %p1141_p4 = pnand (%p759_p11), %p1140_p3, %p1134_p0 }
 0x111   : >> { %v861_v56 = vsel %vm780_vm3, %v860_v52, %v856_v55 }
 0x112   : >> { %v866_v57 = vsel %vm788_vm4, %v865_v53, %v861_v56 }
 0x113   : >> { %867 = vst.msk [vmem:[%s797_s14 + $0x18] sm:$0xff] %vm752_vm1, %v866_v57 }
 0x114   : > { %1144 = shalt.err (!%p1141_p4)
}
 0x115   : > { %s1145_s21 = scalar_lea.hbm %s1351_s23, 1024  ;;  %s1149_s3 = scalar_lea.hbm %s1401_s2, 4096 }
 0x116   : > { %p1146_p7 = scmp.ne.s32.totalorder %s1351_s23, %s1145_s21  ;;  %p1150_p10 = scmp.lt.s32.totalorder %s1351_s23, %s1401_s2 }
 0x117   : > { %p1151_p11 = scmp.lt.s32.totalorder %s1149_s3, %s1145_s21 }
 0x118   : > { %p1147_p8 = pnand %p1146_p7, %p1257_p5 }
 0x119   : > { %p1152_p12 = por %p1151_p11, %p1150_p10 }
 0x11a   : > { %p1148_p9 = pneg %p1147_p8 }
 0x11c   : > { %p1153_p13 = pnand %p1152_p12, %p1148_p9 }
 0x11e   : > { %1156 = shalt.err (!%p1153_p13)
}
 0x11f   : > { %s1202_s6 = smov 128   ;;  %s1203_s7 = smov 8  }
 0x120   : > { %1082 = dma.vmem_to_hbm [thread:$0]  (%p1257_p5), %s1355_s24, 1024, %s1351_s23, %s1359_s25, %s1202_s6, %s1202_s6, %s1203_s7  }
 0x121 PF: > { %p1088_p0 = scmp.ge.s32.totalorder %s1195_s12, 2  ;;  %s898_s8 = sand.u32 1, %s1183_s9  }
 0x122   : > { %s899_s14 = scalar_lea.sflag [#allocation4], %s898_s8 }
 0x123   : > { %p1085_p1 = pnand %p1088_p0, %p1261_p6 }
 0x125   : > { %p1086_p2 = pneg %p1085_p1 }
 0x127   : > { %1178 = dma.done.wait (%p1086_p2), %s899_s14, 1024  }
 0x128   : > { %1180 = vsyncadd (%p1086_p2), %s899_s14, 4294966272  ;;  %p12_p3 = scmp.ge.s32.totalorder %s1244_s15, 6   ;;  %s1404_s9 = smov %s1187_s10 }
 0x129   : > { %s1405_s10 = smov %s1191_s11  ;;  %s1406_s11 = smov %s1255_s18 }
 0x12a   : > { %s1407_s12 = smov %s1244_s15  ;;  %14 = sbr.rel (!%p12_p3) target bundleno = 3 (0x3), region = 86 }
 0x12f   :  { %904 = vsyncpa [#allocation4], 1 }
 0x130   :  { %906 = vsyncpa [#allocation4 + $0x1], 1 }

</bundles_post_ra>
